<compile_context>
chip_gen: v6e
topology: v6e:2x2x1
jax: 0.10.0
libtpu: 0.0.40
codegen_flags: <defaults>
</compile_context>

<pallas_src>
import functools
import math

import jax
import jax.numpy as jnp
from jax.experimental import pallas as pl
from jax.experimental.pallas import tpu as pltpu

EPS = 1e-5          # nn.LayerNorm default
LANE = 128
SUBLANE = 8


def _round_up(a, b):
    return ((a + b - 1) // b) * b


# ---------------------------------------------------------------------------
# Kernel bodies
# ---------------------------------------------------------------------------

def _layernorm_store(h, gamma, beta, o_ref, *, inv_h, valid_h):
    """LayerNorm over the last axis of f32 `h` (true width valid_h) + store.

    Two-pass variance (centered sum of squares). Padded lanes of `h` are zero by
    construction so the mean is exact; centered values are masked before
    squaring. Dropout is eval-mode (identity).
    """
    mean = jnp.sum(h, axis=-1, keepdims=True) * inv_h
    centered = h - mean
    if valid_h != h.shape[-1]:
        lane = jax.lax.broadcasted_iota(jnp.int32, h.shape, h.ndim - 1)
        centered = jnp.where(lane < valid_h, centered, 0.0)
    var = jnp.sum(centered * centered, axis=-1, keepdims=True) * inv_h
    norm = centered * jax.lax.rsqrt(var + EPS)           # rsqrt -> EUP
    # TODO(synk): training-mode dropout would use pltpu.prng_seed / prng_random_bits.
    o_ref[...] = (norm * gamma + beta).astype(o_ref.dtype)


def residual_kernel_resident(x_ref, w_ref, b_ref, g_ref, be_ref, o_ref, *,
                             inv_h, valid_h):
    # x_ref: (tm, Hp)   w_ref: (Hp, Hp) resident   b/g/be: (1, Hp) f32
    x_in = x_ref[...]
    y = jnp.dot(x_in.astype(w_ref.dtype), w_ref[...],
                preferred_element_type=jnp.float32)       # MXU, f32 accumulation
    h = y + b_ref[...] + x_in.astype(jnp.float32)         # bias + residual (f32)
    _layernorm_store(h, g_ref[...], be_ref[...], o_ref, inv_h=inv_h, valid_h=valid_h)


def residual_kernel_ktiled(xk_ref, xfull_ref, w_ref, b_ref, g_ref, be_ref,
                           o_ref, acc_ref, *, inv_h, valid_h):
    # Grid (m, k): k is the contraction axis ("arbitrary", last).
    # xk_ref: (tm, tk) K-slice for the matmul; xfull_ref: (tm, Hp) full row for
    # the residual (block index constant over k -> fetched once per m tile);
    # w_ref: (tk, Hp) streamed weight slice; acc_ref: (tm, Hp) f32 scratch.
    k = pl.program_id(1)

    @pl.when(k == 0)
    def _():
        acc_ref[...] = jnp.zeros_like(acc_ref)

    acc_ref[...] += jnp.dot(xk_ref[...].astype(w_ref.dtype), w_ref[...],
                            preferred_element_type=jnp.float32)

    @pl.when(k == pl.num_programs(1) - 1)
    def _():
        h = acc_ref[...] + b_ref[...] + xfull_ref[...].astype(jnp.float32)
        _layernorm_store(h, g_ref[...], be_ref[...], o_ref,
                         inv_h=inv_h, valid_h=valid_h)


# ---------------------------------------------------------------------------
# One-time parameter preparation (hoisted out of the per-call path)
# ---------------------------------------------------------------------------

def prepare_params(w, b, gamma, beta, *, compute_dtype=None):
    """Do this at parameter-load time, NOT per forward call: transpose the
    nn.Linear weight to (in, out), lane-pad the hidden dim to a multiple of 128
    if needed, pre-cast LN params to f32, and optionally cast W to a faster MXU
    dtype (e.g. jnp.bfloat16)."""
    H = w.shape[0]
    Hp = H if H % LANE == 0 else _round_up(H, LANE)
    w_dt = jnp.dtype(compute_dtype) if compute_dtype is not None else w.dtype
    wt = w.T.astype(w_dt)                                  # (in, out) layout
    if Hp != H:
        wt = jnp.zeros((Hp, Hp), w_dt).at[:H, :H].set(wt)

    def pad_row(v):
        v = v.astype(jnp.float32)
        if Hp != H:
            return jnp.zeros((1, Hp), jnp.float32).at[0, :H].set(v)
        return v.reshape(1, Hp)

    return dict(w=wt, b=pad_row(b), gamma=pad_row(gamma), beta=pad_row(beta),
                hidden=H)


# ---------------------------------------------------------------------------
# Generation-aware tiling / VMEM planning
# ---------------------------------------------------------------------------

def _vmem_caps():
    """Returns (per-core VMEM capacity, budget for this kernel)."""
    try:
        cap = int(pltpu.get_tpu_info().vmem_capacity_bytes)
    except Exception:
        cap = 64 << 20                       # conservative: v7x per-TC VMEM
    budget = int(min(max(cap * 0.78, 16 << 20), 110 << 20))
    return cap, budget


def _pick_tile_m(m_rows, per_row_bytes, avail_bytes):
    if m_rows <= SUBLANE:
        return max(1, m_rows)                # tiny: one full-dim block
    max_rows = max(SUBLANE, avail_bytes // per_row_bytes)
    tm = min(1024, max_rows, _round_up(m_rows, SUBLANE))
    if m_rows >= 2 * SUBLANE:                # >=2 grid steps: keep both v7x TCs busy
        tm = min(tm, _round_up(-(-m_rows // 2), SUBLANE))
    if tm >= 256:
        tm = (tm // 256) * 256               # MXU pass granularity
    else:
        tm = max(SUBLANE, (tm // SUBLANE) * SUBLANE)
    return int(tm)


def _plan(m_rows, hp, act_bytes, w_elem_bytes, force_ktiled):
    cap, budget = _vmem_caps()
    w_total = hp * hp * w_elem_bytes
    params_bytes = 3 * hp * 4
    use_ktiled = force_ktiled or (w_total > 0.45 * budget)

    if not use_ktiled:
        # Resident weight: double-buffered x/out tiles + ~6 f32 temp rows.
        per_row = 2 * hp * act_bytes * 2 + 6 * hp * 4
        avail = budget - w_total - params_bytes
        tile_m = _pick_tile_m(m_rows, per_row, avail)
        tile_k = None
        est = w_total + params_bytes + tile_m * per_row
    else:
        tile_k = 512 if hp % 512 == 0 else (256 if hp % 256 == 0 else LANE)
        w_stream = 2 * tile_k * hp * w_elem_bytes            # double-buffered W slices
        per_row = (hp * 4                     # f32 accumulator scratch
                   + 2 * hp * act_bytes       # output tile (double-buffered)
                   + 2 * hp * act_bytes       # full-width x tile (residual)
                   + 2 * tile_k * act_bytes   # x K-slice (double-buffered)
                   + 4 * hp * 4)              # finalize f32 temps
        avail = budget - w_stream - params_bytes
        tile_m = _pick_tile_m(m_rows, per_row, avail)
        est = w_stream + params_bytes + tile_m * per_row

    vmem_limit = int(min(cap, max(est + (4 << 20), 16 << 20)))
    return tile_m, tile_k, vmem_limit, use_ktiled


# ---------------------------------------------------------------------------
# Forward wrapper
# ---------------------------------------------------------------------------

def residual_net(x, params, *, tile_m=None, tile_k=None, force_ktiled=False):
    """out = dropout(LayerNorm(linear(x) + x)), eval mode. x: (..., H)."""
    H = params["hidden"]
    wp, bp, gp, bep = params["w"], params["b"], params["gamma"], params["beta"]
    assert x.shape[-1] == H
    Hp = wp.shape[0]
    lead = x.shape[:-1]
    M = math.prod(lead) if lead else 1

    act_bytes = jnp.dtype(x.dtype).itemsize
    auto_tm, auto_tk, vmem_limit, use_ktiled = _plan(
        M, Hp, act_bytes, jnp.dtype(wp.dtype).itemsize, force_ktiled)
    if tile_m is None:
        tile_m = auto_tm
    if tile_k is None:
        tile_k = auto_tk

    x2d = x.reshape(M, H)
    if Hp != H:
        # Lane-pad only; the M remainder is handled by the cdiv grid (garbage
        # rows in a partial last tile are per-row-independent and dropped).
        x2d = jnp.zeros((M, Hp), x.dtype).at[:, :H].set(x2d)

    grid_m = pl.cdiv(M, tile_m)
    out_shape = jax.ShapeDtypeStruct((M, Hp), x.dtype)

    if not use_ktiled:
        kernel = functools.partial(residual_kernel_resident,
                                   inv_h=1.0 / H, valid_h=H)
        const = lambda: pl.BlockSpec((1, Hp), lambda i: (0, 0),
                                     pipeline_mode=pl.Buffered(1))
        out = pl.pallas_call(
            kernel,
            out_shape=out_shape,
            grid_spec=pltpu.PrefetchScalarGridSpec(
                num_scalar_prefetch=0,
                grid=(grid_m,),
                in_specs=[
                    # If profiling shows exposed x DMA (most likely v5e), bump
                    # this spec to pipeline_mode=pl.Buffered(3).
                    pl.BlockSpec((tile_m, Hp), lambda i: (i, 0)),   # x tile
                    pl.BlockSpec((Hp, Hp), lambda i: (0, 0),        # W resident
                                 pipeline_mode=pl.Buffered(1)),
                    const(), const(), const(),                      # b, gamma, beta
                ],
                out_specs=pl.BlockSpec((tile_m, Hp), lambda i: (i, 0)),
            ),
            compiler_params=pltpu.CompilerParams(
                dimension_semantics=("parallel",),
                vmem_limit_bytes=vmem_limit,
            ),
        )(x2d, wp, bp, gp, bep)
    else:
        assert Hp % tile_k == 0, "tile_k must divide the (padded) hidden dim"
        grid_k = Hp // tile_k
        kernel = functools.partial(residual_kernel_ktiled,
                                   inv_h=1.0 / H, valid_h=H)
        const = lambda: pl.BlockSpec((1, Hp), lambda i, k: (0, 0),
                                     pipeline_mode=pl.Buffered(1))
        out = pl.pallas_call(
            kernel,
            out_shape=out_shape,
            grid_spec=pltpu.PrefetchScalarGridSpec(
                num_scalar_prefetch=0,
                grid=(grid_m, grid_k),
                in_specs=[
                    pl.BlockSpec((tile_m, tile_k), lambda i, k: (i, k)),  # x K-slice
                    pl.BlockSpec((tile_m, Hp), lambda i, k: (i, 0)),      # x full row
                    pl.BlockSpec((tile_k, Hp), lambda i, k: (k, 0)),      # W K-slice
                    const(), const(), const(),                            # b, gamma, beta
                ],
                out_specs=pl.BlockSpec((tile_m, Hp), lambda i, k: (i, 0)),
                scratch_shapes=[pltpu.VMEM((tile_m, Hp), jnp.float32)],
            ),
            compiler_params=pltpu.CompilerParams(
                dimension_semantics=("parallel", "arbitrary"),
                vmem_limit_bytes=vmem_limit,
            ),
        )(x2d, x2d, wp, bp, gp, bep)

    if Hp != H:
        out = out[:, :H]
    return out.reshape(*lead, H)


# ---------------------------------------------------------------------------
# Pure-JAX reference (PyTorch semantics, eval mode)
# ---------------------------------------------------------------------------

def reference(x, w, b, gamma, beta):
    y = jnp.einsum("...h,oh->...o", x, w) + b
    h = y + x
    mu = jnp.mean(h, axis=-1, keepdims=True)
    var = jnp.mean((h - mu) ** 2, axis=-1, keepdims=True)
    return (h - mu) / jnp.sqrt(var + EPS) * gamma + beta


if __name__ == "__main__":
    key = jax.random.PRNGKey(0)
    k1, k2, k3, k4, k5, k6 = jax.random.split(key, 6)

    # --- Test 1: module-spec small shapes (resident-weight path; H=32 < 128
    #             exercises the lane-padded / masked-LN path). ---
    B, S, H = 2, 8, 32
    x = jax.random.normal(k1, (B, S, H), dtype=jnp.float32)
    bound = 1.0 / jnp.sqrt(H)
    w = jax.random.uniform(k2, (H, H), minval=-bound, maxval=bound, dtype=jnp.float32)
    b = jax.random.uniform(k3, (H,), minval=-bound, maxval=bound, dtype=jnp.float32)
    gamma = jnp.ones((H,), jnp.float32)
    beta = jnp.zeros((H,), jnp.float32)

    params = prepare_params(w, b, gamma, beta)      # one-time, hoisted out of the call path
    out = residual_net(x, params)
    jax.block_until_ready(out)
    ref = reference(x, w, b, gamma, beta)
    assert out.shape == (B, S, H)
    assert jnp.allclose(out, ref, atol=1e-4, rtol=1e-4), "resident-path mismatch"

    # --- Test 2: lane-aligned H (no wrapper pad/slice round-trip) with the
    #             K-tiled weight-streaming fallback forced on (exercises the
    #             large-H path: accumulator scratch + pl.when init/finalize). ---
    B2, S2, H2 = 2, 64, 256
    x2 = jax.random.normal(k4, (B2, S2, H2), dtype=jnp.float32)
    bound2 = 1.0 / jnp.sqrt(H2)
    w2 = jax.random.uniform(k5, (H2, H2), minval=-bound2, maxval=bound2, dtype=jnp.float32)
    b2 = jax.random.uniform(k6, (H2,), minval=-bound2, maxval=bound2, dtype=jnp.float32)
    g2 = jnp.ones((H2,), jnp.float32)
    be2 = jnp.zeros((H2,), jnp.float32)

    params2 = prepare_params(w2, b2, g2, be2)
    out2 = residual_net(x2, params2, tile_k=128, force_ktiled=True)
    jax.block_until_ready(out2)
    ref2 = reference(x2, w2, b2, g2, be2)
    assert out2.shape == (B2, S2, H2)
    assert jnp.allclose(out2, ref2, atol=1e-3, rtol=1e-3), "k-tiled-path mismatch"

    print("KERNEL_OK")
</pallas_src>

<mosaic_0001>
module attributes {stable_mosaic.version = 11 : i64} {
  func.func @residual_kernel_resident(%arg0: i32, %arg1: memref<8x128xf32, #tpu.memory_space<vmem>>, %arg2: memref<128x128xf32, #tpu.memory_space<vmem>>, %arg3: memref<1x128xf32, #tpu.memory_space<vmem>>, %arg4: memref<1x128xf32, #tpu.memory_space<vmem>>, %arg5: memref<1x128xf32, #tpu.memory_space<vmem>>, %arg6: memref<8x128xf32, #tpu.memory_space<vmem>>) attributes {dimension_semantics = [#tpu.dimension_semantics<parallel>], iteration_bounds = array<i64: 2>, scalar_prefetch = 0 : i64, scratch_operands = 0 : i64, tpu.core_type = #tpu.core_type<tc>, window_params = [{transform_indices = @transform_0, window_bounds = array<i64: 8, 128>}, {pipeline_mode = #tpu.pipeline_mode<synchronous>, transform_indices = @transform_1, window_bounds = array<i64: 128, 128>}, {pipeline_mode = #tpu.pipeline_mode<synchronous>, transform_indices = @transform_2, window_bounds = array<i64: 1, 128>}, {pipeline_mode = #tpu.pipeline_mode<synchronous>, transform_indices = @transform_3, window_bounds = array<i64: 1, 128>}, {pipeline_mode = #tpu.pipeline_mode<synchronous>, transform_indices = @transform_4, window_bounds = array<i64: 1, 128>}, {transform_indices = @transform_5, window_bounds = array<i64: 8, 128>}]} {
    %c0 = arith.constant 0 : index
    %c0_0 = arith.constant 0 : index
    %0 = vector.load %arg1[%c0, %c0_0] : memref<8x128xf32, #tpu.memory_space<vmem>>, vector<8x128xf32>
    %c0_1 = arith.constant 0 : index
    %c0_2 = arith.constant 0 : index
    %1 = vector.load %arg2[%c0_1, %c0_2] : memref<128x128xf32, #tpu.memory_space<vmem>>, vector<128x128xf32>
    %cst = arith.constant dense<0.000000e+00> : vector<8x128xf32>
    %2 = tpu.matmul %0, %1, %cst {dimension_numbers = #tpu.dot_dimension_numbers<[1], [0], [0], [1], [0, 0, 1, 1], [], []>} : vector<8x128xf32>, vector<128x128xf32>, vector<8x128xf32> -> vector<8x128xf32>
    %c0_3 = arith.constant 0 : index
    %c0_4 = arith.constant 0 : index
    %3 = vector.load %arg3[%c0_3, %c0_4] : memref<1x128xf32, #tpu.memory_space<vmem>>, vector<1x128xf32>
    %4 = vector.broadcast %3 : vector<1x128xf32> to vector<8x128xf32>
    %5 = arith.addf %2, %4 : vector<8x128xf32>
    %6 = arith.addf %5, %0 : vector<8x128xf32>
    %c0_5 = arith.constant 0 : index
    %c0_6 = arith.constant 0 : index
    %7 = vector.load %arg4[%c0_5, %c0_6] : memref<1x128xf32, #tpu.memory_space<vmem>>, vector<1x128xf32>
    %c0_7 = arith.constant 0 : index
    %c0_8 = arith.constant 0 : index
    %8 = vector.load %arg5[%c0_7, %c0_8] : memref<1x128xf32, #tpu.memory_space<vmem>>, vector<1x128xf32>
    %cst_9 = arith.constant dense<0.000000e+00> : vector<8xf32>
    %9 = vector.multi_reduction <add>, %6, %cst_9 [1] : vector<8x128xf32> to vector<8xf32>
    %10 = vector.shape_cast %9 : vector<8xf32> to vector<8x1xf32>
    %cst_10 = arith.constant 3.125000e-02 : f32
    %11 = vector.broadcast %cst_10 : f32 to vector<8x1xf32>
    %12 = arith.mulf %10, %11 : vector<8x1xf32>
    %13 = vector.broadcast %12 : vector<8x1xf32> to vector<8x128xf32>
    %14 = arith.subf %6, %13 : vector<8x128xf32>
    %15 = tpu.iota {dimensions = array<i32: 1>} : vector<8x128xi32>
    %c32_i32 = arith.constant 32 : i32
    %16 = vector.broadcast %c32_i32 : i32 to vector<8x128xi32>
    %17 = arith.cmpi slt, %15, %16 : vector<8x128xi32>
    %cst_11 = arith.constant 0.000000e+00 : f32
    %18 = vector.broadcast %cst_11 : f32 to vector<8x128xf32>
    %19 = arith.select %17, %14, %18 : vector<8x128xi1>, vector<8x128xf32>
    %20 = arith.mulf %19, %19 : vector<8x128xf32>
    %cst_12 = arith.constant dense<0.000000e+00> : vector<8xf32>
    %21 = vector.multi_reduction <add>, %20, %cst_12 [1] : vector<8x128xf32> to vector<8xf32>
    %22 = vector.shape_cast %21 : vector<8xf32> to vector<8x1xf32>
    %cst_13 = arith.constant 3.125000e-02 : f32
    %23 = vector.broadcast %cst_13 : f32 to vector<8x1xf32>
    %24 = arith.mulf %22, %23 : vector<8x1xf32>
    %cst_14 = arith.constant 9.99999974E-6 : f32
    %25 = vector.broadcast %cst_14 : f32 to vector<8x1xf32>
    %26 = arith.addf %24, %25 : vector<8x1xf32>
    %27 = math.rsqrt %26 : vector<8x1xf32>
    %28 = vector.broadcast %27 : vector<8x1xf32> to vector<8x128xf32>
    %29 = arith.mulf %19, %28 : vector<8x128xf32>
    %30 = vector.broadcast %7 : vector<1x128xf32> to vector<8x128xf32>
    %31 = arith.mulf %29, %30 : vector<8x128xf32>
    %32 = vector.broadcast %8 : vector<1x128xf32> to vector<8x128xf32>
    %33 = arith.addf %31, %32 : vector<8x128xf32>
    %c0_15 = arith.constant 0 : index
    %c0_16 = arith.constant 0 : index
    %34 = vector.load %arg6[%c0_15, %c0_16] : memref<8x128xf32, #tpu.memory_space<vmem>>, vector<8x128xf32>
    tpu.vector_store %arg6[%c0_15, %c0_16], %33 {strides = array<i32>} : memref<8x128xf32, #tpu.memory_space<vmem>>, vector<8x128xf32>,
    return
  }
  func.func @transform_0(%arg0: i32) -> (i32, i32) {
    %c0_i32 = arith.constant 0 : i32
    %c0_i32_0 = arith.constant 0 : i32
    return %arg0, %c0_i32 : i32, i32
  }
  func.func @transform_1(%arg0: i32) -> (i32, i32) {
    %c0_i32 = arith.constant 0 : i32
    %c0_i32_0 = arith.constant 0 : i32
    %c0_i32_1 = arith.constant 0 : i32
    return %c0_i32, %c0_i32_0 : i32, i32
  }
  func.func @transform_2(%arg0: i32) -> (i32, i32) {
    %c0_i32 = arith.constant 0 : i32
    %c0_i32_0 = arith.constant 0 : i32
    %c0_i32_1 = arith.constant 0 : i32
    return %c0_i32, %c0_i32_0 : i32, i32
  }
  func.func @transform_3(%arg0: i32) -> (i32, i32) {
    %c0_i32 = arith.constant 0 : i32
    %c0_i32_0 = arith.constant 0 : i32
    %c0_i32_1 = arith.constant 0 : i32
    return %c0_i32, %c0_i32_0 : i32, i32
  }
  func.func @transform_4(%arg0: i32) -> (i32, i32) {
    %c0_i32 = arith.constant 0 : i32
    %c0_i32_0 = arith.constant 0 : i32
    %c0_i32_1 = arith.constant 0 : i32
    return %c0_i32, %c0_i32_0 : i32, i32
  }
  func.func @transform_5(%arg0: i32) -> (i32, i32) {
    %c0_i32 = arith.constant 0 : i32
    %c0_i32_0 = arith.constant 0 : i32
    return %arg0, %c0_i32 : i32, i32
  }
}

</mosaic_0001>

<bundles_post_ra>
// kernel: tpu_custom_call.1
= control target key start
LH: loop header
LB: loop body
LE: loop exit
PB: predicated region body
PF: predicated region fallthrough
CT: control target
= control target key end

     0   :  { %10 = vsyncpa [#allocation3], 0  ;;  %s939_s0 = inlined_call_operand.hbm [shape: f32[16,128], index: 0, kind: input, shape index: {}]   ;;  %s940_s1 = inlined_call_operand.hbm [shape: f32[128,128], index: 1, kind: input, shape index: {}]   ;;  %s941_s2 = inlined_call_operand.vmem [shape: f32[1,128], index: 2, kind: input, shape index: {}]   ;;  %s942_s3 = inlined_call_operand.vmem [shape: f32[1,128], index: 3, kind: input, shape index: {}]   ;;  %s943_s4 = inlined_call_operand.vmem [shape: f32[1,128], index: 4, kind: input, shape index: {}]   ;;  %s944_s5 = inlined_call_operand.hbm [shape: f32[16,128], index: 5, kind: output, shape index: {}]  }
   0x1   :  { %12 = vsyncpa [#allocation3 + $0x1], 0 }
   0x2   :  { %13 = vsyncpa [#allocation6], 0 }
   0x3   :  { %14 = vsyncpa [#allocation4], 0 }
   0x4   :  { %16 = vsyncpa [#allocation4 + $0x1], 0  ;;  %s769_s18 = smov 0   ;;  %s771_s19 = smov 0  }
   0x5   :  { %s773_s20 = smov 0   ;;  %s775_s21 = smov 0  }
   0x6 LB: > { %s790_s22 = sadd.s32 4294967295, %s730_s21   ;;  %s476_s23 = sadd.s32 4294967294, %s730_s21   ;;  %s730_s21 = sphi %s775_s21, %s966_s21   ;;  %s726_s20 = sphi %s773_s20, %s965_s20   ;;  %s722_s19 = sphi %s771_s19, %s964_s19   ;;  %s718_s18 = sphi %s769_s18, %s963_s18  }
   0x7   : > { %p42_p0 = scmp.ne.s32.totalorder %s722_s19, %s718_s18  ;;  %p945_p1 = scmp.eq.s32.totalorder %s790_s22, 0 }
   0x8   : > { %p156_p3 = scmp.eq.s32.totalorder %s476_s23, 1  ;;  %p477_p5 = scmp.ge.s32.totalorder %s730_s21, 1 }
   0x9   : > { %p799_p4 = por %p945_p1, %p42_p0  ;;  %p163_p7 = scmp.lt.s32.totalorder %s730_s21, 3 }
   0xa   : > { %p804_p6 = por %p156_p3, %p42_p0  ;;  %s732_s27 = smov [#allocation5]  }
   0xb   : > { %s949_s24 = scalar_select %p799_p4, 1, 0 }
   0xc   : > { %s950_s25 = scalar_select %p804_p6, 1, 0 }
   0xd   : > { %p809_p8 = pnand %p477_p5, %p163_p7  ;;  %s175_s28 = sshll.u32 %s732_s27, 4  ;;  %s176_s28 = int_to_ptr.vmem [resolvable:$true] %s175_s28 }
   0xe   : > { %s823_s30 = sadd.s32 1, %s730_s21   ;;  %s29_s6 = sadd.s32 1, %s726_s20 }
   0xf   : > { %s951_s26 = scalar_select %p809_p8, 1, 0 }
  0x10   : > { %p553_p9 = pneg %p809_p8  ;;  %s26_s7 = ssub.s32 %s730_s21, %s823_s30 }
  0x11   : > { %s619_s8 = scalar_lea.vmem %s176_s28, 2048  ;;  %p627_p5 = scmp.lt.s32.totalorder %s176_s28, %s176_s28 }
  0x12   : > { %p818_p11 = pnand %p553_p9, %p945_p1  ;;  %p620_p13 = scmp.ne.s32.totalorder %s176_s28, %s619_s8 }
  0x13   : > { %p628_p7 = scmp.lt.s32.totalorder %s619_s8, %s619_s8 }
  0x14   : > { %p610_p12 = pneg %p818_p11 }
  0x15   : > { %p629_p10 = por %p628_p7, %p627_p5 }
  0x16   : > { %p622_p0 = pnand %p620_p13, %p610_p12 }
  0x18   : > { %p623_p3 = pneg %p622_p0 }
  0x1a   : > { %p630_p2 = pnand %p629_p10, %p623_p3 }
  0x1c   : > { %633 = shalt.err (!%p630_p2)
}
  0x1d   : > { %s733_s9 = smov 128   ;;  %s734_s10 = smov 8  }
  0x1e   : > { %556 = dma.hbm_to_vmem [thread:$0]  (!%p818_p11), %s940_s1, 2048, %s176_s28, [#allocation6], %s733_s9, %s733_s9, %s734_s10  }
  0x1f   : > { %p27_p9 = scmp.eq.s32.totalorder %s26_s7, 0  ;;  %p36_p12 = scmp.ne.s32.totalorder %s726_s20, %s722_s19 }
  0x20   : > { %p37_p10 = scmp.eq.s32.totalorder %s730_s21, 0  ;;  %p566_p2 = scmp.lt.s32.totalorder %s730_s21, 2 }
  0x21   : > { %s840_s13 = scalar_select %p27_p9, %s726_s20, %s29_s6  }
  0x22   : > { %p38_p13 = por %p37_p10, %p36_p12  ;;  %p953_p0 = scmp.eq.s32.totalorder %s790_s22, 1 }
  0x23   : > { %s198_s15 = sand.u32 1, %s726_s20   ;;  %s481_s16 = sshll.u32 %s730_s21, 7 }
  0x24   : > { %p844_p3 = por %p953_p0, %p36_p12  ;;  %s480_s17 = sshll.u32 %s198_s15, 3 }
  0x25   : > { %s853_s29 = scalar_lea.hbm %s939_s0, %s481_s16  ;;  %s202_s28 = scalar_lea.vmem [#allocation2], %s480_s17 }
  0x26   : > { %s954_s14 = scalar_select %p844_p3, 1, 0 }
  0x27   : > { %s209_s6 = sshll.u32 %s202_s28, 4  ;;  %p855_p11 = pnand %p566_p2, %p38_p13  ;;  %s210_s6 = int_to_ptr.vmem [resolvable:$true] %s209_s6 }
  0x28   : > { %s199_s8 = scalar_lea.sflag [#allocation3], %s198_s15  ;;  %s634_s9 = scalar_lea.hbm %s853_s29, 128 }
  0x29   : > { %p635_p5 = scmp.ne.s32.totalorder %s853_s29, %s634_s9  ;;  %p636_p7 = pneg %p855_p11 }
  0x2a   : > { %s639_s12 = scalar_lea.hbm %s939_s0, 256  ;;  %p640_p10 = scmp.lt.s32.totalorder %s853_s29, %s939_s0 }
  0x2b   : > { %p637_p9 = pnand %p636_p7, %p635_p5  ;;  %p641_p2 = scmp.lt.s32.totalorder %s639_s12, %s634_s9 }
  0x2d   : > { %p638_p12 = pneg %p637_p9  ;;  %p642_p13 = por %p641_p2, %p640_p10 }
  0x2f   : > { %p643_p0 = pnand %p642_p13, %p638_p12 }
  0x31   : > { %646 = shalt.err (!%p643_p0)
}
  0x32   : > { %s647_s23 = scalar_lea.vmem %s210_s6, 128  ;;  %s735_s15 = smov [#allocation2]  }
  0x33   : > { %p648_p1 = scmp.ne.s32.totalorder %s210_s6, %s647_s23  ;;  %s652_s27 = sshll.u32 %s735_s15, 4  ;;  %s653_s27 = int_to_ptr.vmem [resolvable:$false] %s652_s27 }
  0x34   : > { %s654_s28 = scalar_lea.vmem %s653_s27, 256  ;;  %p655_p5 = scmp.lt.s32.totalorder %s210_s6, %s653_s27 }
  0x35   : > { %p650_p6 = pnand %p648_p1, %p636_p7  ;;  %p656_p9 = scmp.lt.s32.totalorder %s654_s28, %s647_s23 }
  0x37   : > { %p651_p3 = pneg %p650_p6  ;;  %p657_p4 = por %p656_p9, %p655_p5 }
  0x39   : > { %p658_p8 = pnand %p657_p4, %p651_p3 }
  0x3b   : > { %661 = shalt.err (!%p658_p8)
}
  0x3c   : > { %560 = dma.hbm_to_vmem [thread:$0]  (!%p855_p11), %s853_s29, 128, %s210_s6, %s199_s8  }
  0x3d   : > { %p956_p12 = scmp.ne.s32.totalorder %s951_s26, 0 }
  0x3e   : > { %s876_s9 = sand.u32 (!%p956_p12), 1, %s722_s19   ;;  %p957_p1 = scmp.ne.s32.totalorder (!%p956_p12), %s949_s24, 0 }
  0x3f   : > { %218 = sbr.rel (%p956_p12) target bundleno = 622 (0x26e), region = 40  ;;  %s483_s10 = sshll.u32 (!%p956_p12), %s876_s9, 3 }
  0x40   : > { %s221_s11 = scalar_lea.sflag (!%p956_p12), [#allocation3], %s876_s9  ;;  %s882_s12 = scalar_lea.vmem (!%p956_p12), [#allocation2], %s483_s10 }
  0x44   : > { %705 = dma.done.wait (%p957_p1), %s221_s11, 128  }
  0x45   : > { %707 = vsyncadd (%p957_p1), %s221_s11, 4294967168  ;;  %p958_p4 = scmp.eq.s32.totalorder %s790_s22, 0 }
  0x47   : > { %709 = dma.done.wait (%p958_p4), [#allocation6], 2048   ;;  %p959_p6 = pmov %p958_p4 }
  0x48   : > { %v736_v0 = vmov 0.0   ;;  %vm737_vm0 = vmmov 0   ;;  %v271_v1 = vld [vmem:[#allocation5 + $0x78] sm:$0xff]  ;;  %v270_v2 = vld [vmem:[#allocation5 + $0x70] sm:$0xff]  ;;  %v269_v3 = vld [vmem:[#allocation5 + $0x68] sm:$0xff]  ;;  %v356_v23 = vlaneseq  ;;  %s490_s16 = sshll.u32 %s790_s22, 7 }
  0x49   : > { %711 = vsyncadd (%p959_p6), [#allocation6], 4294965248  ;;  %510 = vmatprep.subr.mxu0 %v736_v0  ;;  %542 = vmatprep.mubr.msk.f32.mxu0 %vm737_vm0, %v736_v0  ;;  %v268_v4 = vld [vmem:[#allocation5 + $0x60] sm:$0xff]  ;;  %v267_v5 = vld [vmem:[#allocation5 + $0x58] sm:$0xff]  ;;  %s254_s17 = scalar_lea.vmem [#allocation7], %s483_s10  ;;  %s394_s28 = scalar_lea.hbm %s944_s5, %s490_s16 }
  0x4a   : > { %511 = vmatpush3.msra.mxu0 %v271_v1  ;;  %v266_v6 = vld [vmem:[#allocation5 + $0x50] sm:$0xff]  ;;  %v265_v7 = vld [vmem:[#allocation5 + $0x48] sm:$0xff]  ;;  %v264_v8 = vld [vmem:[#allocation5 + $0x40] sm:$0xff]  ;;  %v357_v24 = vand.u32 127, %v356_v23  ;;  %s396_s23 = sshll.u32 %s254_s17, 4  ;;  %s383_s11 = scalar_lea.sflag [#allocation4], %s876_s9  ;;  %s397_s23 = int_to_ptr.vmem [resolvable:$true] %s396_s23 }
  0x4b   : > { %512 = vmatprep.subr.mxu0 %v736_v0  ;;  %v263_v9 = vld [vmem:[#allocation5 + $0x38] sm:$0xff]  ;;  %v262_v10 = vld [vmem:[#allocation5 + $0x30] sm:$0xff]  ;;  %v261_v11 = vld [vmem:[#allocation5 + $0x28] sm:$0xff]  ;;  %p960_p3 = scmp.ne.s32.totalorder %s954_s14, 0  ;;  %s738_s24 = smov [#allocation7]  }
  0x4c   : > { %513 = vmatpush3.msra.mxu0 %v270_v2  ;;  %v260_v12 = vld [vmem:[#allocation5 + $0x20] sm:$0xff]  ;;  %v259_v13 = vld [vmem:[#allocation5 + $0x18] sm:$0xff]  ;;  %v258_v14 = vld [vmem:[#allocation5 + $0x10] sm:$0xff]  ;;  %vm358_vm1 = vcmp.lt.s32.totalorder %v357_v24, 32  ;;  %s666_s26 = sshll.u32 %s738_s24, 4  ;;  %s667_s26 = int_to_ptr.vmem [resolvable:$false] %s666_s26 }
  0x4d   : > { %514 = vmatprep.subr.mxu0 %v736_v0  ;;  %v257_v15 = vld [vmem:[#allocation5 + $0x8] sm:$0xff]  ;;  %v256_v16 = vld [vmem:[#allocation5] sm:$0xff]  ;;  %v255_v17 = vld [vmem:[%s882_s12] sm:$0xff]  ;;  %s662_s12 = scalar_lea.vmem %s397_s23, 128  ;;  %s668_s22 = scalar_lea.vmem %s667_s26, 256 }
  0x4e   : > { %515 = vmatpush3.msra.mxu0 %v269_v3  ;;  %v486_v18 = vld [vmem:[%s941_s2] ss:$0 sm:$0xff]  ;;  %p663_p8 = scmp.ne.s32.totalorder %s397_s23, %s662_s12  ;;  %p669_p10 = scmp.lt.s32.totalorder %s397_s23, %s667_s26 }
  0x4f   : > { %516 = vmatprep.subr.mxu0 %v736_v0  ;;  %v487_v34 = vld [vmem:[%s942_s3] ss:$0 sm:$0xff]  ;;  %p670_p2 = scmp.lt.s32.totalorder %s668_s22, %s662_s12 }
  0x50   : > { %517 = vmatpush3.msra.mxu0 %v268_v4  ;;  %v488_v36 = vld [vmem:[%s943_s4] ss:$0 sm:$0xff]  ;;  %p664_p11 = pnand %p663_p8, %p960_p3 }
  0x51   : > { %518 = vmatprep.subr.mxu0 %v736_v0  ;;  %p671_p13 = por %p670_p2, %p669_p10 }
  0x52   : > { %519 = vmatpush3.msra.mxu0 %v267_v5  ;;  %p665_p7 = pneg %p664_p11 }
  0x53   : > { %520 = vmatprep.subr.mxu0 %v736_v0 }
  0x54   : > { %521 = vmatpush3.msra.mxu0 %v266_v6  ;;  %p672_p0 = pnand %p671_p13, %p665_p7 }
  0x55   : > { %522 = vmatprep.subr.mxu0 %v736_v0 }
  0x56   : > { %523 = vmatpush3.msra.mxu0 %v265_v7 }
  0x57   : > { %524 = vmatprep.subr.mxu0 %v736_v0 }
  0x58   : > { %525 = vmatpush3.msra.mxu0 %v264_v8 }
  0x59   : > { %526 = vmatprep.subr.mxu0 %v736_v0 }
  0x5a   : > { %527 = vmatpush3.msra.mxu0 %v263_v9 }
  0x5b   : > { %528 = vmatprep.subr.mxu0 %v736_v0 }
  0x5c   : > { %529 = vmatpush3.msra.mxu0 %v262_v10 }
  0x5d   : > { %530 = vmatprep.subr.mxu0 %v736_v0 }
  0x5e   : > { %531 = vmatpush3.msra.mxu0 %v261_v11 }
  0x5f   : > { %532 = vmatprep.subr.mxu0 %v736_v0 }
  0x60   : > { %533 = vmatpush3.msra.mxu0 %v260_v12 }
  0x61   : > { %534 = vmatprep.subr.mxu0 %v736_v0 }
  0x62   : > { %535 = vmatpush3.msra.mxu0 %v259_v13 }
  0x63   : > { %536 = vmatprep.subr.mxu0 %v736_v0 }
  0x64   : > { %537 = vmatpush3.msra.mxu0 %v258_v14 }
  0x65   : > { %538 = vmatprep.subr.mxu0 %v736_v0 }
  0x66   : > { %539 = vmatpush3.msra.mxu0 %v257_v15 }
  0x67   : > { %540 = vmatprep.subr.mxu0 %v736_v0 }
  0x68   : > { %541 = vmatpush3.msra.mxu0 %v256_v16 }
  0x69   : > { %543 = vmatmul.mubr.f32.vlgmr.msra.gmra.mxu0 %v255_v17 }
 0x129   : > { %v345_v19 = vpop.f32.mrf.mxu0 }
 0x12a   : > { %v346_v20 = vadd.f32 %v486_v18, %v345_v19 }
 0x12b   : > { %v544_v21 = vpop.f32.mrf.mxu0 }
 0x12c   : > { %v349_v22 = vadd.f32 %v346_v20, %v255_v17 }
 0x12e   : > { %352 = vadd.xlane.f32.xlu0 %v349_v22 }
 0x1b7   : > { %v353_v25 = vpop.xlane.xlu0 %352 }
 0x1b8   : > { %v354_v26 = vmul.f32 0.03125, %v353_v25 }
 0x1ba   : > { %v355_v27 = vsub.f32 %v349_v22, %v354_v26 }
 0x1bc   : > { %v359_v28 = vsel %vm358_vm1, %v355_v27, 0.0 }
 0x1bd   : > { %v360_v29 = vmul.f32 %v359_v28, %v359_v28 }
 0x1bf   : > { %361 = vadd.xlane.f32.xlu0 %v360_v29 }
 0x248   : > { %v362_v30 = vpop.xlane.xlu0 %361 }
 0x249   : > { %v363_v31 = vmul.f32 0.03125, %v362_v30 }
 0x24b   : > { %v364_v32 = vadd.f32 1e-05, %v363_v31 }
 0x24d   : > { %606 = vrsqrt.f32 %v364_v32 }
 0x25a   : > { %v607_v33 = vpop.eup %606 }
 0x25b   : > { %v366_v35 = vmul.f32 %v607_v33, %v359_v28 }
 0x25d   : > { %v373_v37 = vmul.f32 %v487_v34, %v366_v35 }
 0x25f   : > { %v380_v38 = vadd.f32 %v488_v36, %v373_v37 }
 0x261   : > { %381 = vst [vmem:[%s254_s17] sm:$0xff] %v380_v38 }
 0x262   : > { %675 = shalt.err (!%p672_p0)
}
 0x263   : > { %s676_s10 = scalar_lea.hbm %s394_s28, 128  ;;  %s680_s6 = scalar_lea.hbm %s944_s5, 256 }
 0x264   : > { %p677_p5 = scmp.ne.s32.totalorder %s394_s28, %s676_s10  ;;  %p681_p1 = scmp.lt.s32.totalorder %s394_s28, %s944_s5 }
 0x265   : > { %p682_p4 = scmp.lt.s32.totalorder %s680_s6, %s676_s10 }
 0x266   : > { %p678_p9 = pnand %p677_p5, %p960_p3 }
 0x267   : > { %p683_p6 = por %p682_p4, %p681_p1 }
 0x268   : > { %p679_p12 = pneg %p678_p9 }
 0x26a   : > { %p684_p8 = pnand %p683_p6, %p679_p12 }
 0x26c   : > { %687 = shalt.err (!%p684_p8)
}
 0x26d   : > { %551 = dma.vmem_to_hbm [thread:$0]  (%p960_p3), %s397_s23, 128, %s394_s28, %s383_s11  }
 0x26e PF: > { %s408_s16 = sand.u32 1, %s718_s18   ;;  %p961_p11 = scmp.ne.s32.totalorder %s950_s25, 0 }
 0x26f   : > { %p962_p7 = scmp.ge.s32.totalorder %s730_s21, 2  ;;  %s409_s17 = scalar_lea.sflag [#allocation4], %s408_s16 }
 0x271   : > { %p562_p10 = pnand %p962_p7, %p961_p11 }
 0x273   : > { %p563_p2 = pneg %p562_p10 }
 0x275   : > { %713 = dma.done.wait (%p563_p2), %s409_s17, 128  }
 0x276   : > { %715 = vsyncadd (%p563_p2), %s409_s17, 4294967168  ;;  %p19_p13 = scmp.ge.s32.totalorder %s823_s30, 4   ;;  %s963_s18 = smov %s722_s19 }
 0x277   : > { %s964_s19 = smov %s726_s20  ;;  %s965_s20 = smov %s840_s13 }
 0x278   : > { %s966_s21 = smov %s823_s30  ;;  %21 = sbr.rel (!%p19_p13) target bundleno = 6 (0x6), region = 89 }
 0x27d   :  { %414 = vsyncpa [#allocation3], 1 }
 0x27e   :  { %416 = vsyncpa [#allocation3 + $0x1], 1 }
 0x27f   :  { %417 = vsyncpa [#allocation6], 1 }
 0x280   :  { %418 = vsyncpa [#allocation4], 1 }
 0x281   :  { %420 = vsyncpa [#allocation4 + $0x1], 1 }

</bundles_post_ra>
